<compile_context>
chip_gen: v5e
topology: v5e:2x2
jax: 0.10.0
libtpu: 0.0.40
codegen_flags: <defaults>
</compile_context>

<pallas_src>
import jax
import jax.numpy as jnp
import numpy as np
from jax.experimental import pallas as pl
from jax.experimental.pallas import tpu as pltpu


# -----------------------------------------------------------------------------
# Kernel
# -----------------------------------------------------------------------------
def _drop_path_kernel(scale_ref, x_ref, o_ref):
    # scale_ref: (tb, 1)  per-sample scale (0 or 1/keep_prob), in x's dtype.
    # x_ref/o_ref: (tb, tm) lane-dense tiles of the flattened input/output.
    o_ref[...] = x_ref[...] * scale_ref[...]


# -----------------------------------------------------------------------------
# Tiling helpers
# -----------------------------------------------------------------------------
def _round_down(x, m):
    return (x // m) * m


def _round_up(x, m):
    return ((x + m - 1) // m) * m


def _tpu_vmem_capacity_bytes():
    """Physical VMEM per TensorCore; conservative (v7x-sized) fallback."""
    try:
        cap = getattr(pltpu.get_tpu_info(), "vmem_capacity_bytes", None)
        if cap:
            return int(cap)
    except Exception:
        pass
    return 64 << 20


def _choose_tiles(B, M, itemsize):
    """Pick (tb, tm, vmem_limit_bytes). Blocks need not divide B/M exactly."""
    vmem_cap = _tpu_vmem_capacity_bytes()
    small_vmem = vmem_cap <= (64 << 20)              # v7x-class: 64 MiB / TC
    pair_budget = (8 << 20) if small_vmem else (16 << 20)   # one (x + out) tile pair
    limit_cap = (48 << 20) if small_vmem else (96 << 20)    # vmem_limit_bytes ceiling

    # dtype-aware sublane packing: 8 rows/vreg f32, 16 bf16/f16, 32 int8/fp8.
    sub_align = max(8, 32 // max(1, itemsize))

    # ---- batch tile (sublane dim): multiple of sub_align, or full B ----------
    if B <= sub_align:
        tb = B                                       # full-extent block: always legal
    elif B % sub_align == 0:
        tb = min(B, 256)
    else:
        tb = min(_round_down(B, sub_align), 256)     # ragged last band via cdiv grid

    # ---- feature tile (lane dim): 128-aligned, fits the tile-pair budget -----
    if 2 * tb * M * itemsize <= pair_budget:
        tm = M                                       # whole rows (full-extent: legal)
    else:
        max_tm = pair_budget // (2 * tb * itemsize)
        tm = max(128, _round_down(max_tm, 128))      # cdiv grid handles ragged last block

    # ---- megacore friendliness: >=2 grid steps for mid-sized inputs ----------
    total_bytes = B * M * itemsize
    if pl.cdiv(B, tb) * pl.cdiv(M, tm) == 1 and total_bytes >= (2 << 20):
        if M >= 256:
            tm = max(128, _round_up(pl.cdiv(M, 2), 128))
        elif B >= 2 * sub_align:
            tb = _round_up(pl.cdiv(B, 2), sub_align)

    # ---- explicit VMEM budget: double-buffered x + out tiles, plus headroom --
    tile_bytes = tb * tm * itemsize
    vmem_limit = int(min(limit_cap, max(16 << 20, 4 * tile_bytes + (4 << 20))))
    return tb, tm, vmem_limit


# -----------------------------------------------------------------------------
# Pallas wrapper
# -----------------------------------------------------------------------------
def drop_path_pallas(x, scale, *, donate_x=False):
    """out[b] = x[b] * scale[b].  x: (B, ...), scale: (B,) float."""
    orig_shape = x.shape
    B = int(orig_shape[0])
    M = int(np.prod(orig_shape[1:])) if x.ndim > 1 else 1
    itemsize = jnp.dtype(x.dtype).itemsize

    x2 = x.reshape(B, M)                             # lane-dense last dim
    scale2 = scale.astype(x.dtype).reshape(B, 1)     # native-dtype per-sample scale

    tb, tm, vmem_limit = _choose_tiles(B, M, itemsize)
    grid = (pl.cdiv(B, tb), pl.cdiv(M, tm))          # ragged last blocks are fine

    out = pl.pallas_call(
        _drop_path_kernel,
        out_shape=jax.ShapeDtypeStruct((B, M), x.dtype),
        grid_spec=pltpu.PrefetchScalarGridSpec(
            num_scalar_prefetch=0,
            grid=grid,
            in_specs=[
                # scale block index only depends on i -> re-fetched once per row-band
                pl.BlockSpec((tb, 1), lambda i, j: (i, 0)),
                pl.BlockSpec((tb, tm), lambda i, j: (i, j)),
            ],
            out_specs=pl.BlockSpec((tb, tm), lambda i, j: (i, j)),
        ),
        compiler_params=pltpu.CompilerParams(
            dimension_semantics=("parallel", "parallel"),
            vmem_limit_bytes=vmem_limit,
        ),
        # If x is dead after DropPath (typical residual-branch use), write in place.
        input_output_aliases=({1: 0} if donate_x else {}),
    )(scale2, x2)
    return out.reshape(orig_shape)


def drop_path(x, drop_prob=0.0, training=False, *, key=None):
    """JAX/Pallas equivalent of the PyTorch drop_path / DropPath.forward."""
    if drop_prob == 0.0 or not training:
        return x
    if key is None:
        raise ValueError(
            "drop_path(training=True, drop_prob>0) requires an explicit PRNG `key`.")
    keep_prob = 1.0 - drop_prob
    # Same construction as the PyTorch reference: floor(keep_prob + U[0,1)) in {0,1}.
    u = jax.random.uniform(key, (x.shape[0],), dtype=jnp.float32)
    mask = jnp.floor(keep_prob + u)
    scale = mask / keep_prob                         # 0 or 1/keep_prob per sample
    return drop_path_pallas(x, scale)


def drop_path_reference(x, scale):
    """Plain-JAX reference mirroring the PyTorch math, given the same mask."""
    B = x.shape[0]
    s = scale.astype(x.dtype).reshape((B,) + (1,) * (x.ndim - 1))
    return x * s


# -----------------------------------------------------------------------------
# Self-test
# -----------------------------------------------------------------------------
if __name__ == "__main__":
    key = jax.random.PRNGKey(0)
    kx, kmask, kx2, kmask2, kx3, kmask3, kx4, kmask4 = jax.random.split(key, 8)

    drop_prob = 0.25
    keep_prob = 1.0 - drop_prob

    # --- Case 1: small ViT-token-shaped input (batch=2, seq=8, hidden=32) ----
    B, N, C = 2, 8, 32
    x = jax.random.normal(kx, (B, N, C), dtype=jnp.float32)

    # Eval / p=0 paths are identities, exactly as in the PyTorch module.
    assert drop_path(x, drop_prob, training=False) is x
    assert drop_path(x, 0.0, training=True) is x

    out = jax.block_until_ready(drop_path(x, drop_prob, training=True, key=kmask))
    u = jax.random.uniform(kmask, (B,), dtype=jnp.float32)
    scale = jnp.floor(keep_prob + u) / keep_prob
    ref = drop_path_reference(x, scale)
    np.testing.assert_allclose(np.asarray(out), np.asarray(ref), rtol=1e-6, atol=1e-6)

    # --- Case 2: bf16, multi-row tiles, native-dtype math ----------------------
    B2, N2, C2 = 16, 64, 256
    x2 = jax.random.normal(kx2, (B2, N2, C2), dtype=jnp.bfloat16)
    u2 = jax.random.uniform(kmask2, (B2,), dtype=jnp.float32)
    scale2 = jnp.floor(keep_prob + u2) / keep_prob
    out2 = jax.block_until_ready(drop_path_pallas(x2, scale2))
    ref2 = drop_path_reference(x2, scale2)
    np.testing.assert_allclose(np.asarray(jnp.asarray(out2, jnp.float32)),
                               np.asarray(jnp.asarray(ref2, jnp.float32)),
                               rtol=1e-2, atol=1e-2)

    # --- Case 3: ragged batch band (B not a multiple of 8), M not 128-aligned --
    B3, N3, C3 = 10, 197, 64
    x3 = jax.random.normal(kx3, (B3, N3, C3), dtype=jnp.float32)
    u3 = jax.random.uniform(kmask3, (B3,), dtype=jnp.float32)
    scale3 = jnp.floor(keep_prob + u3) / keep_prob
    out3 = jax.block_until_ready(drop_path_pallas(x3, scale3))
    ref3 = drop_path_reference(x3, scale3)
    np.testing.assert_allclose(np.asarray(out3), np.asarray(ref3), rtol=1e-6, atol=1e-6)

    # --- Case 4: ViT-like awkward M (197*384), forced >=2-step grid, ragged tm -
    B4, N4, C4 = 8, 197, 384
    x4 = jax.random.normal(kx4, (B4, N4, C4), dtype=jnp.float32)
    u4 = jax.random.uniform(kmask4, (B4,), dtype=jnp.float32)
    scale4 = jnp.floor(keep_prob + u4) / keep_prob
    out4 = jax.block_until_ready(drop_path_pallas(x4, scale4))
    ref4 = drop_path_reference(x4, scale4)
    np.testing.assert_allclose(np.asarray(out4), np.asarray(ref4), rtol=1e-6, atol=1e-6)

    print("KERNEL_OK")
</pallas_src>

<mosaic_0001>
module attributes {stable_mosaic.version = 11 : i64} {
  func.func @_drop_path_kernel(%arg0: i32, %arg1: i32, %arg2: memref<2x1xf32, #tpu.memory_space<vmem>>, %arg3: memref<2x256xf32, #tpu.memory_space<vmem>>, %arg4: memref<2x256xf32, #tpu.memory_space<vmem>>) attributes {dimension_semantics = [#tpu.dimension_semantics<parallel>, #tpu.dimension_semantics<parallel>], iteration_bounds = array<i64: 1, 1>, scalar_prefetch = 0 : i64, scratch_operands = 0 : i64, tpu.core_type = #tpu.core_type<tc>, window_params = [{transform_indices = @transform_0, window_bounds = array<i64: 2, 1>}, {transform_indices = @transform_1, window_bounds = array<i64: 2, 256>}, {transform_indices = @transform_2, window_bounds = array<i64: 2, 256>}]} {
    %c0 = arith.constant 0 : index
    %c0_0 = arith.constant 0 : index
    %0 = vector.load %arg3[%c0, %c0_0] : memref<2x256xf32, #tpu.memory_space<vmem>>, vector<2x256xf32>
    %c0_1 = arith.constant 0 : index
    %c0_2 = arith.constant 0 : index
    %1 = vector.load %arg2[%c0_1, %c0_2] : memref<2x1xf32, #tpu.memory_space<vmem>>, vector<2x1xf32>
    %2 = vector.broadcast %1 : vector<2x1xf32> to vector<2x256xf32>
    %3 = arith.mulf %0, %2 : vector<2x256xf32>
    %c0_3 = arith.constant 0 : index
    %c0_4 = arith.constant 0 : index
    %4 = vector.load %arg4[%c0_3, %c0_4] : memref<2x256xf32, #tpu.memory_space<vmem>>, vector<2x256xf32>
    tpu.vector_store %arg4[%c0_3, %c0_4], %3 {strides = array<i32>} : memref<2x256xf32, #tpu.memory_space<vmem>>, vector<2x256xf32>,
    return
  }
  func.func @transform_0(%arg0: i32, %arg1: i32) -> (i32, i32) {
    %c0_i32 = arith.constant 0 : i32
    %c0_i32_0 = arith.constant 0 : i32
    return %arg0, %c0_i32 : i32, i32
  }
  func.func @transform_1(%arg0: i32, %arg1: i32) -> (i32, i32) {
    %c0_i32 = arith.constant 0 : i32
    return %arg0, %arg1 : i32, i32
  }
  func.func @transform_2(%arg0: i32, %arg1: i32) -> (i32, i32) {
    %c0_i32 = arith.constant 0 : i32
    return %arg0, %arg1 : i32, i32
  }
}

</mosaic_0001>

<bundles_post_ra>
// kernel: tpu_custom_call.1
= control target key start
LH: loop header
LB: loop body
LE: loop exit
PB: predicated region body
PF: predicated region fallthrough
CT: control target
= control target key end

     0   :  { %7 = vsyncpa [#allocation3], 0  ;;  %s141_s0 = inlined_call_operand.vmem [shape: f32[2,1], index: 0, kind: input, shape index: {}]   ;;  %s142_s1 = inlined_call_operand.hbm [shape: f32[2,256], index: 1, kind: input, shape index: {}]   ;;  %s143_s2 = inlined_call_operand.hbm [shape: f32[2,256], index: 2, kind: output, shape index: {}]  }
   0x1   :  { %8 = vsyncpa [#allocation4], 0  ;;  %s16_s11 = sshll.u32 %s142_s1, 4  ;;  %s113_s12 = smov [#allocation2]   ;;  %s17_s11 = int_to_ptr.hbm [resolvable:$true] %s16_s11 }
   0x2   :  { %s18_s13 = sshll.u32 %s113_s12, 4  ;;  %s19_s13 = int_to_ptr.vmem [resolvable:$true] %s18_s13 }
   0x3   :  { %21 = dma.hbm_to_vmem [thread:$0]  %s17_s11, 64, %s19_s13, [#allocation3]  }
   0x4   :  { %109 = dma.done.wait [#allocation3], 64  }
   0x5   :  { %110 = vsyncadd [#allocation3], 4294967232  ;;  %v114_v0 = vmov 0   ;;  %v27_v1 = vld [vmem:[%s141_s0] sm:$0x3]  ;;  %s116_s1 = smov [#allocation5]  }
   0x6   :  { %60 = vset.pattern.permute.xlu0 %v114_v0  ;;  %v115_v2 = vmov 269488144   ;;  %v26_v6 = vld [vmem:[#allocation2] sm:$0xf]  ;;  %s44_s16 = sshll.u32 %s116_s1, 4  ;;  %s46_s19 = sshll.u32 %s143_s2, 4  ;;  %s45_s16 = int_to_ptr.vmem [resolvable:$true] %s44_s16  ;;  %s47_s19 = int_to_ptr.hbm [resolvable:$true] %s46_s19 }
   0x7   :  { %30 = vperm.xlu0 %60, %v27_v1   ;;  %v33_v3 = vunpack.c.l.s4 %v115_v2 }
   0x9   :  { %v34_v4 = vunpack.c.0.s8 %v33_v3 }
  0x79   :  { %v31_v5 = vpop.permute.xlu0 %30 }
  0x7a   :  { %v35_v7 = vperm.slane %v31_v5, %v34_v4 }
  0x7c   :  { %v37_v8 = vmul.f32 %v35_v7, %v26_v6 }
  0x7e   :  { %38 = vst [vmem:[#allocation5] sm:$0xf] %v37_v8 }
  0x7f   :  { %49 = dma.vmem_to_hbm [thread:$0]  %s45_s16, 64, %s47_s19, [#allocation4]  }
  0x80   :  { %111 = dma.done.wait [#allocation4], 64  }
  0x81   :  { %112 = vsyncadd [#allocation4], 4294967232 }
  0x82   :  { %54 = vsyncpa [#allocation3], 1 }
  0x83   :  { %55 = vsyncpa [#allocation4], 1 }

</bundles_post_ra>
